<compile_context>
chip_gen: v7x
topology: tpu7x:2x2x1
jax: 0.10.0
libtpu: 0.0.40
codegen_flags: <defaults>
</compile_context>

<pallas_src>
import math
import re

import jax
import jax.numpy as jnp
from jax import lax
from jax.experimental import pallas as pl
from jax.experimental.pallas import tpu as pltpu


def _round_up(x, m):
    return ((x + m - 1) // m) * m


def _cdiv(a, b):
    return -(-a // b)


def _detect_tpu():
    """Returns (generation, per-core VMEM capacity bytes), with safe fallbacks."""
    gen = None
    vmem = None
    try:
        info = pltpu.get_tpu_info()
        vmem = int(getattr(info, "vmem_capacity_bytes"))
    except Exception:
        vmem = None
    try:
        kind = jax.devices()[0].device_kind.lower()
        m = re.search(r"(\d+)", kind)
        if m:
            gen = int(m.group(1))
    except Exception:
        gen = None
    if gen is None:
        gen = 6
    phys = (64 if gen >= 7 else 128) * 1024 * 1024   # per-TC physical VMEM
    if vmem is None or vmem <= 0:
        vmem = phys
    vmem = min(vmem, phys)
    return gen, vmem


def ffn_kernel(x_ref, w1t_ref, b1_ref, w2_ref, b2_ref, o_ref, acc_ref):
    """One (row_tile, d_model) output tile; grid axis 1 streams d_ff slices."""
    k = pl.program_id(1)

    @pl.when(k == 0)
    def _():
        acc_ref[...] = jnp.zeros_like(acc_ref)

    # h = relu(x @ w1[:, slice] + b1[slice]).  w1 is streamed pre-transposed as
    # (d_ff, d_model), so each (ff_tile, d_model) slice is a contiguous HBM block;
    # the transpose is folded into dot_general's contracting dims (MXU handles it).
    h = lax.dot_general(x_ref[...], w1t_ref[...],
                        dimension_numbers=(((1,), (1,)), ((), ())),
                        preferred_element_type=jnp.float32)
    # Epilogue (bias + ReLU) in b1's dtype: bf16 on v6e/v7x, f32 on v5e.
    h = h.astype(b1_ref.dtype)
    h = jnp.maximum(h + b1_ref[...], 0)

    # Dropout: eval/inference mode -> identity.
    # TODO(synk): training-mode dropout (PRNG mask + 1/(1-p) rescale) not implemented.

    # Accumulate the partial second matmul into the resident f32 scratch.
    acc_ref[...] += jnp.dot(h.astype(w2_ref.dtype), w2_ref[...],
                            preferred_element_type=jnp.float32)

    @pl.when(k == pl.num_programs(1) - 1)
    def _():
        o_ref[...] = (acc_ref[...] + b2_ref[...]).astype(o_ref.dtype)


def feed_forward_block(x, w1, b1, w2, b2, *, compute_dtype=jnp.bfloat16,
                       row_tile=None, ff_tile=None):
    """x: (B, S, d_model). w1: (d_model, d_ff), w2: (d_ff, d_model).

    Weights are stored (in_features, out_features), i.e. transposed relative to
    PyTorch nn.Linear's (out, in) weight.
    """
    B, S, d_model = x.shape
    assert w1.shape[0] == d_model and w2.shape[1] == d_model
    d_ff = w1.shape[1]
    n_rows = B * S
    out_dtype = x.dtype

    gen, vmem_cap = _detect_tpu()
    vmem_limit = int(vmem_cap * 0.80)       # scoped VMEM limit for the kernel
    budget = int(vmem_limit * 0.85)         # headroom for compiler internals

    in_b = jnp.dtype(compute_dtype).itemsize
    out_b = jnp.dtype(out_dtype).itemsize

    # Epilogue (bias add + ReLU) dtype: v6e/v7x have bf16 VALUs; v5e keeps f32.
    if jnp.dtype(compute_dtype) == jnp.dtype(jnp.float32) or gen < 6:
        epilogue_dtype = jnp.float32
    else:
        epilogue_dtype = compute_dtype
    epi_b = jnp.dtype(epilogue_dtype).itemsize
    h_b = 4 + epi_b + in_b                  # f32 matmul result + epilogue + cast copies

    def working_set(rt, ft):
        return (2 * rt * d_model * in_b                # x tile (double-buffered)
                + 2 * 2 * ft * d_model * in_b          # w1 + w2 slices (double-buffered)
                + 2 * (ft * epi_b + d_model * 4)       # bias slices
                + 2 * rt * d_model * out_b             # output tile
                + rt * d_model * 4                     # f32 accumulator scratch
                + rt * ft * h_b)                       # h intermediate

    # --- Row tiling (sets arithmetic intensity; see header comment).
    if row_tile is None:
        row_tile = {5: 256, 6: 1024, 7: 512}.get(gen, 512)
    n_rows_p8 = _round_up(n_rows, 8)
    row_tile = max(8, min(_round_up(int(row_tile), 8), n_rows_p8))
    # v7x megacore: keep >= 2 row tiles so both TensorCores get work.
    if gen >= 7 and n_rows_p8 > 8 and _cdiv(n_rows_p8, row_tile) < 2:
        row_tile = _round_up(_cdiv(n_rows_p8, 2), 8)
    # Shrink row_tile if even the minimal d_ff slice would not fit the VMEM budget.
    min_ft = min(d_ff, 128)
    while row_tile > 8 and working_set(row_tile, min_ft) > budget:
        row_tile = max(8, _round_up(row_tile // 2, 8))

    # --- d_ff tiling: lane-aligned (multiple of 128) or the full dimension,
    #     sized against the VMEM working-set model.
    if ff_tile is None:
        cap = min(4096, _round_up(d_ff, 128))
        max_fit = 128
        t = cap
        while t >= 128:
            if working_set(row_tile, t) <= budget:
                max_fit = t
                break
            t -= 128
        if d_ff <= max_fit:
            ff_tile = d_ff                      # single slice covering all of d_ff
        else:
            ff_tile = None
            t = (max_fit // 128) * 128
            while t >= 128:                     # prefer an exact lane-aligned divisor
                if d_ff % t == 0:
                    ff_tile = t
                    break
                t -= 128
            if ff_tile is None:                 # none exists: balance slices, pad d_ff
                n_slices = _cdiv(d_ff, max_fit)
                ff_tile = _round_up(_cdiv(d_ff, n_slices), 128)
    else:
        ff_tile = int(ff_tile)
        if ff_tile >= d_ff:
            ff_tile = d_ff
        else:
            ff_tile = _round_up(ff_tile, 128)   # lane alignment for sliced specs
            if ff_tile >= d_ff:
                ff_tile = d_ff

    d_ff_p = d_ff if ff_tile == d_ff else _round_up(d_ff, ff_tile)
    n_rows_p = _round_up(n_rows, row_tile)
    n_row_tiles = n_rows_p // row_tile
    n_ff_tiles = d_ff_p // ff_tile

    # --- Prepare operands (pad rows of x; pad d_ff of w1/b1/w2 with zeros).
    x2 = x.reshape(n_rows, d_model)
    if n_rows_p != n_rows:
        x2 = jnp.pad(x2, ((0, n_rows_p - n_rows), (0, 0)))
    x2 = x2.astype(compute_dtype)

    # w1 pre-transposed to (d_ff, d_model): contiguous HBM slices when streaming.
    w1t = jnp.transpose(w1).astype(compute_dtype)
    w2c = w2.astype(compute_dtype)
    b1_2d = b1.reshape(1, d_ff).astype(epilogue_dtype)
    b2_2d = b2.reshape(1, d_model).astype(jnp.float32)
    if d_ff_p != d_ff:
        pad_ff = d_ff_p - d_ff
        w1t = jnp.pad(w1t, ((0, pad_ff), (0, 0)))
        w2c = jnp.pad(w2c, ((0, pad_ff), (0, 0)))
        b1_2d = jnp.pad(b1_2d, ((0, 0), (0, pad_ff)))

    cost = pl.CostEstimate(
        flops=4 * n_rows_p * d_model * d_ff_p,   # two (n, d_model, d_ff) matmuls
        transcendentals=0,
        bytes_accessed=int(
            n_rows_p * d_model * (in_b + out_b)               # x + out
            + n_row_tiles * 2 * d_model * d_ff_p * in_b       # re-streamed weights
            + n_row_tiles * (d_ff_p * epi_b + d_model * 4)    # biases
        ),
    )

    out2 = pl.pallas_call(
        ffn_kernel,
        out_shape=jax.ShapeDtypeStruct((n_rows_p, d_model), out_dtype),
        grid_spec=pltpu.PrefetchScalarGridSpec(
            num_scalar_prefetch=0,
            grid=(n_row_tiles, n_ff_tiles),
            in_specs=[
                pl.BlockSpec((row_tile, d_model), lambda i, k: (i, 0)),  # x tile
                pl.BlockSpec((ff_tile, d_model),  lambda i, k: (k, 0)),  # w1.T slice
                pl.BlockSpec((1, ff_tile),        lambda i, k: (0, k)),  # b1 slice
                pl.BlockSpec((ff_tile, d_model),  lambda i, k: (k, 0)),  # w2 slice
                pl.BlockSpec((1, d_model),        lambda i, k: (0, 0)),  # b2
            ],
            out_specs=pl.BlockSpec((row_tile, d_model), lambda i, k: (i, 0)),
            scratch_shapes=[pltpu.VMEM((row_tile, d_model), jnp.float32)],
        ),
        compiler_params=pltpu.CompilerParams(
            dimension_semantics=("parallel", "arbitrary"),
            vmem_limit_bytes=vmem_limit,
        ),
        cost_estimate=cost,
    )(x2, w1t, b1_2d, w2c, b2_2d)

    if n_rows_p != n_rows:
        out2 = out2[:n_rows]
    return out2.reshape(B, S, d_model)


def init_params(key, d_model, d_ff):
    """PyTorch-nn.Linear-style init: U(-1/sqrt(fan_in), 1/sqrt(fan_in))."""
    k1, k2, k3, k4 = jax.random.split(key, 4)
    bound1 = 1.0 / math.sqrt(d_model)
    bound2 = 1.0 / math.sqrt(d_ff)
    w1 = jax.random.uniform(k1, (d_model, d_ff), jnp.float32, -bound1, bound1)
    b1 = jax.random.uniform(k2, (d_ff,),         jnp.float32, -bound1, bound1)
    w2 = jax.random.uniform(k3, (d_ff, d_model), jnp.float32, -bound2, bound2)
    b2 = jax.random.uniform(k4, (d_model,),      jnp.float32, -bound2, bound2)
    return w1, b1, w2, b2


if __name__ == "__main__":
    # Small shapes consistent with the module's forward: (batch, seq, d_model).
    batch, seq, d_model, d_ff = 2, 8, 32, 64
    dropout_p = 0.1  # eval mode -> identity

    key = jax.random.PRNGKey(0)
    k_x, k_p = jax.random.split(key)
    x = jax.random.normal(k_x, (batch, seq, d_model), jnp.float32)
    w1, b1, w2, b2 = init_params(k_p, d_model, d_ff)

    # Pure-JAX reference (eval-mode dropout == identity).
    ref = jnp.maximum(x @ w1 + b1, 0.0) @ w2 + b2

    # f32 compute path: tight tolerance.
    out_f32 = jax.block_until_ready(
        feed_forward_block(x, w1, b1, w2, b2, compute_dtype=jnp.float32))
    assert out_f32.shape == (batch, seq, d_model)
    assert jnp.allclose(out_f32, ref, atol=1e-5, rtol=1e-5), "f32 mismatch vs reference"

    # bf16 compute path (MXU-native, f32 accumulation): relaxed tolerance.
    out_bf16 = jax.block_until_ready(
        feed_forward_block(x, w1, b1, w2, b2, compute_dtype=jnp.bfloat16))
    assert out_bf16.shape == (batch, seq, d_model)
    assert jnp.allclose(out_bf16, ref, atol=5e-2, rtol=5e-2), "bf16 mismatch vs reference"

    # Exercise the multi-slice d_ff reduction, d_ff zero-padding (320 -> 384) and
    # row padding (21 -> 32) paths with explicit tile overrides.
    d_model2, d_ff2 = 128, 320
    x2 = jax.random.normal(jax.random.PRNGKey(2), (3, 7, d_model2), jnp.float32)
    w1b, b1b, w2b, b2b = init_params(jax.random.PRNGKey(3), d_model2, d_ff2)
    ref2 = jnp.maximum(x2 @ w1b + b1b, 0.0) @ w2b + b2b
    out2 = jax.block_until_ready(
        feed_forward_block(x2, w1b, b1b, w2b, b2b, compute_dtype=jnp.float32,
                           row_tile=16, ff_tile=128))
    assert out2.shape == (3, 7, d_model2)
    assert jnp.allclose(out2, ref2, atol=1e-4, rtol=1e-4), "tiled/padded path mismatch"

    print("KERNEL_OK")
</pallas_src>

<mosaic_0001>
module attributes {stable_mosaic.version = 11 : i64} {
  func.func @ffn_kernel(%arg0: i32, %arg1: i32, %arg2: memref<16x32xf32, #tpu.memory_space<vmem>>, %arg3: memref<64x32xf32, #tpu.memory_space<vmem>>, %arg4: memref<1x64xf32, #tpu.memory_space<vmem>>, %arg5: memref<64x32xf32, #tpu.memory_space<vmem>>, %arg6: memref<1x32xf32, #tpu.memory_space<vmem>>, %arg7: memref<16x32xf32, #tpu.memory_space<vmem>>, %arg8: memref<16x32xf32, #tpu.memory_space<vmem>>) attributes {dimension_semantics = [#tpu.dimension_semantics<parallel>, #tpu.dimension_semantics<arbitrary>], iteration_bounds = array<i64: 1, 1>, scalar_prefetch = 0 : i64, scratch_operands = 1 : i64, tpu.core_type = #tpu.core_type<tc>, window_params = [{transform_indices = @transform_0, window_bounds = array<i64: 16, 32>}, {transform_indices = @transform_1, window_bounds = array<i64: 64, 32>}, {transform_indices = @transform_2, window_bounds = array<i64: 1, 64>}, {transform_indices = @transform_3, window_bounds = array<i64: 64, 32>}, {pipeline_mode = #tpu.pipeline_mode<synchronous>, transform_indices = @transform_4, window_bounds = array<i64: 1, 32>}, {transform_indices = @transform_5, window_bounds = array<i64: 16, 32>}]} {
    %c0_i32 = arith.constant 0 : i32
    %0 = arith.cmpi eq, %arg1, %c0_i32 : i32
    %1 = arith.extui %0 : i1 to i32
    %c0_i32_0 = arith.constant 0 : i32
    %2 = arith.cmpi ne, %1, %c0_i32_0 : i32
    scf.if %2 {
      %cst_16 = arith.constant 0.000000e+00 : f32
      %19 = vector.broadcast %cst_16 : f32 to vector<16x32xf32>
      %c0_17 = arith.constant 0 : index
      %c0_18 = arith.constant 0 : index
      %20 = vector.load %arg8[%c0_17, %c0_18] : memref<16x32xf32, #tpu.memory_space<vmem>>, vector<16x32xf32>
      tpu.vector_store %arg8[%c0_17, %c0_18], %19 {strides = array<i32>} : memref<16x32xf32, #tpu.memory_space<vmem>>, vector<16x32xf32>,
    } else {
    }
    %c0 = arith.constant 0 : index
    %c0_1 = arith.constant 0 : index
    %3 = vector.load %arg2[%c0, %c0_1] : memref<16x32xf32, #tpu.memory_space<vmem>>, vector<16x32xf32>
    %c0_2 = arith.constant 0 : index
    %c0_3 = arith.constant 0 : index
    %4 = vector.load %arg3[%c0_2, %c0_3] : memref<64x32xf32, #tpu.memory_space<vmem>>, vector<64x32xf32>
    %cst = arith.constant dense<0.000000e+00> : vector<16x64xf32>
    %5 = tpu.matmul %3, %4, %cst {dimension_numbers = #tpu.dot_dimension_numbers<[1], [1], [0], [0], [0, 0, 1, 0], [], []>} : vector<16x32xf32>, vector<64x32xf32>, vector<16x64xf32> -> vector<16x64xf32>
    %c0_4 = arith.constant 0 : index
    %c0_5 = arith.constant 0 : index
    %6 = vector.load %arg4[%c0_4, %c0_5] : memref<1x64xf32, #tpu.memory_space<vmem>>, vector<1x64xf32>
    %7 = vector.broadcast %6 : vector<1x64xf32> to vector<16x64xf32>
    %8 = arith.addf %5, %7 : vector<16x64xf32>
    %cst_6 = arith.constant 0.000000e+00 : f32
    %9 = vector.broadcast %cst_6 : f32 to vector<16x64xf32>
    %10 = arith.maximumf %8, %9 : vector<16x64xf32>
    %c0_7 = arith.constant 0 : index
    %c0_8 = arith.constant 0 : index
    %11 = vector.load %arg8[%c0_7, %c0_8] : memref<16x32xf32, #tpu.memory_space<vmem>>, vector<16x32xf32>
    %c0_9 = arith.constant 0 : index
    %c0_10 = arith.constant 0 : index
    %12 = vector.load %arg5[%c0_9, %c0_10] : memref<64x32xf32, #tpu.memory_space<vmem>>, vector<64x32xf32>
    %cst_11 = arith.constant dense<0.000000e+00> : vector<16x32xf32>
    %13 = tpu.matmul %10, %12, %cst_11 {dimension_numbers = #tpu.dot_dimension_numbers<[1], [0], [0], [1], [0, 0, 1, 1], [], []>} : vector<16x64xf32>, vector<64x32xf32>, vector<16x32xf32> -> vector<16x32xf32>
    %14 = arith.addf %11, %13 : vector<16x32xf32>
    %c0_12 = arith.constant 0 : index
    %c0_13 = arith.constant 0 : index
    %15 = vector.load %arg8[%c0_12, %c0_13] : memref<16x32xf32, #tpu.memory_space<vmem>>, vector<16x32xf32>
    tpu.vector_store %arg8[%c0_12, %c0_13], %14 {strides = array<i32>} : memref<16x32xf32, #tpu.memory_space<vmem>>, vector<16x32xf32>,
    %c0_i32_14 = arith.constant 0 : i32
    %16 = arith.cmpi eq, %arg1, %c0_i32_14 : i32
    %17 = arith.extui %16 : i1 to i32
    %c0_i32_15 = arith.constant 0 : i32
    %18 = arith.cmpi ne, %17, %c0_i32_15 : i32
    scf.if %18 {
      %c0_16 = arith.constant 0 : index
      %c0_17 = arith.constant 0 : index
      %19 = vector.load %arg8[%c0_16, %c0_17] : memref<16x32xf32, #tpu.memory_space<vmem>>, vector<16x32xf32>
      %c0_18 = arith.constant 0 : index
      %c0_19 = arith.constant 0 : index
      %20 = vector.load %arg6[%c0_18, %c0_19] : memref<1x32xf32, #tpu.memory_space<vmem>>, vector<1x32xf32>
      %21 = vector.broadcast %20 : vector<1x32xf32> to vector<16x32xf32>
      %22 = arith.addf %19, %21 : vector<16x32xf32>
      %c0_20 = arith.constant 0 : index
      %c0_21 = arith.constant 0 : index
      %23 = vector.load %arg7[%c0_20, %c0_21] : memref<16x32xf32, #tpu.memory_space<vmem>>, vector<16x32xf32>
      tpu.vector_store %arg7[%c0_20, %c0_21], %22 {strides = array<i32>} : memref<16x32xf32, #tpu.memory_space<vmem>>, vector<16x32xf32>,
    } else {
    }
    return
  }
  func.func @transform_0(%arg0: i32, %arg1: i32) -> (i32, i32) {
    %c0_i32 = arith.constant 0 : i32
    %c0_i32_0 = arith.constant 0 : i32
    return %arg0, %c0_i32 : i32, i32
  }
  func.func @transform_1(%arg0: i32, %arg1: i32) -> (i32, i32) {
    %c0_i32 = arith.constant 0 : i32
    %c0_i32_0 = arith.constant 0 : i32
    return %arg1, %c0_i32 : i32, i32
  }
  func.func @transform_2(%arg0: i32, %arg1: i32) -> (i32, i32) {
    %c0_i32 = arith.constant 0 : i32
    %c0_i32_0 = arith.constant 0 : i32
    return %c0_i32, %arg1 : i32, i32
  }
  func.func @transform_3(%arg0: i32, %arg1: i32) -> (i32, i32) {
    %c0_i32 = arith.constant 0 : i32
    %c0_i32_0 = arith.constant 0 : i32
    return %arg1, %c0_i32 : i32, i32
  }
  func.func @transform_4(%arg0: i32, %arg1: i32) -> (i32, i32) {
    %c0_i32 = arith.constant 0 : i32
    %c0_i32_0 = arith.constant 0 : i32
    %c0_i32_1 = arith.constant 0 : i32
    return %c0_i32, %c0_i32_0 : i32, i32
  }
  func.func @transform_5(%arg0: i32, %arg1: i32) -> (i32, i32) {
    %c0_i32 = arith.constant 0 : i32
    %c0_i32_0 = arith.constant 0 : i32
    return %arg0, %c0_i32 : i32, i32
  }
}

</mosaic_0001>

<bundles_post_ra>
// kernel: tpu_custom_call.1
= control target key start
LH: loop header
LB: loop body
LE: loop exit
PB: predicated region body
PF: predicated region fallthrough
CT: control target
= control target key end

     0   :  { %10 = vsyncpa [#allocation4], 0  ;;  %s769_s0 = inlined_call_operand.hbm [shape: f32[16,32], index: 0, kind: input, shape index: {}]   ;;  %s770_s1 = inlined_call_operand.hbm [shape: f32[64,32], index: 1, kind: input, shape index: {}]   ;;  %s771_s2 = inlined_call_operand.hbm [shape: f32[1,64], index: 2, kind: input, shape index: {}]   ;;  %s772_s3 = inlined_call_operand.hbm [shape: f32[64,32], index: 3, kind: input, shape index: {}]   ;;  %s773_s4 = inlined_call_operand.hbm [shape: f32[1,32], index: 4, kind: input, shape index: {}]   ;;  %s774_s5 = inlined_call_operand.hbm [shape: f32[16,32], index: 5, kind: output, shape index: {}]  }
   0x1   :  { %11 = vsyncpa [#allocation7], 0 }
   0x2   :  { %12 = vsyncpa [#allocation10], 0 }
   0x3   :  { %13 = vsyncpa [#allocation5], 0  ;;  %s609_s18 = smov [#allocation6]   ;;  %s610_s20 = smov [#allocation9]  }
   0x4   :  { %s31_s19 = sshll.u32 %s609_s18, 4  ;;  %s53_s21 = sshll.u32 %s610_s20, 4  ;;  %s32_s19 = int_to_ptr.vmem [resolvable:$true] %s31_s19  ;;  %s648_s21 = int_to_ptr.vmem [resolvable:$true] %s53_s21 }
   0x5   :  { %s469_s24 = scalar_lea.hbm %s770_s1, 1024 }
   0x6   :  { %p470_p0 = scmp.ne.s32.totalorder %s770_s1, %s469_s24  ;;  %p473_p1 = scmp.lt.u32.totalorder %s469_s24, %s770_s1 }
   0x8   :  { %p475_p2 = pnand %p473_p1, %p470_p0 }
   0xa   :  { %478 = shalt.err (!%p475_p2)
}
   0xb   :  { %s479_s29 = scalar_lea.vmem %s32_s19, 1024  ;;  %p484_p4 = scmp.lt.s32.totalorder %s32_s19, %s32_s19 }
   0xc   :  { %p480_p3 = scmp.ne.s32.totalorder %s32_s19, %s479_s29  ;;  %p485_p5 = scmp.lt.s32.totalorder %s479_s29, %s479_s29 }
   0xe   :  { %p486_p6 = por %p485_p5, %p484_p4 }
  0x10   :  { %p487_p7 = pnand %p486_p6, %p480_p3 }
  0x12   :  { %490 = shalt.err (!%p487_p7)
}
  0x13   :  { %s611_s30 = smov 128   ;;  %s612_s6 = smov 8  }
  0x14   :  { %37 = dma.hbm_to_vmem [thread:$0]  %s770_s1, 1024, %s32_s19, [#allocation7], %s611_s30, %s611_s30, %s612_s6  }
  0x15   :  { %s491_s11 = scalar_lea.hbm %s772_s3, 1024 }
  0x16   :  { %p492_p8 = scmp.ne.s32.totalorder %s772_s3, %s491_s11  ;;  %p495_p9 = scmp.lt.u32.totalorder %s491_s11, %s772_s3 }
  0x18   :  { %p497_p10 = pnand %p495_p9, %p492_p8 }
  0x1a   :  { %500 = shalt.err (!%p497_p10)
}
  0x1b   :  { %s501_s16 = scalar_lea.vmem %s648_s21, 1024  ;;  %p506_p12 = scmp.lt.s32.totalorder %s648_s21, %s648_s21 }
  0x1c   :  { %p502_p11 = scmp.ne.s32.totalorder %s648_s21, %s501_s16  ;;  %p507_p13 = scmp.lt.s32.totalorder %s501_s16, %s501_s16 }
  0x1e   :  { %p508_p0 = por %p507_p13, %p506_p12 }
  0x20   :  { %p509_p1 = pnand %p508_p0, %p502_p11 }
  0x22   :  { %512 = shalt.err (!%p509_p1)
}
  0x23   :  { %59 = dma.hbm_to_vmem [thread:$0]  %s772_s3, 1024, %s648_s21, [#allocation10], %s611_s30, %s611_s30, %s612_s6  }
  0x24   :  { %s613_s18 = smov [#allocation3]   ;;  %s614_s20 = smov [#allocation8]  }
  0x25   :  { %s19_s19 = sshll.u32 %s613_s18, 4  ;;  %s44_s22 = sshll.u32 %s614_s20, 4  ;;  %s20_s19 = int_to_ptr.vmem [resolvable:$true] %s19_s19  ;;  %s45_s22 = int_to_ptr.vmem [resolvable:$true] %s44_s22 }
  0x26   :  { %s513_s25 = scalar_lea.hbm %s769_s0, 256 }
  0x27   :  { %p514_p2 = scmp.ne.s32.totalorder %s769_s0, %s513_s25  ;;  %p517_p3 = scmp.lt.u32.totalorder %s513_s25, %s769_s0 }
  0x29   :  { %p519_p4 = pnand %p517_p3, %p514_p2 }
  0x2b   :  { %522 = shalt.err (!%p519_p4)
}
  0x2c   :  { %s523_s3 = scalar_lea.vmem %s20_s19, 256  ;;  %p528_p6 = scmp.lt.s32.totalorder %s20_s19, %s20_s19 }
  0x2d   :  { %p524_p5 = scmp.ne.s32.totalorder %s20_s19, %s523_s3  ;;  %p529_p7 = scmp.lt.s32.totalorder %s523_s3, %s523_s3 }
  0x2f   :  { %p530_p8 = por %p529_p7, %p528_p6 }
  0x31   :  { %p531_p9 = pnand %p530_p8, %p524_p5 }
  0x33   :  { %534 = shalt.err (!%p531_p9)
}
  0x34   :  { %25 = dma.hbm_to_vmem [thread:$0]  %s769_s0, 256, %s20_s19, [#allocation4], %s611_s30, %s611_s30, %s612_s6  }
  0x35   :  { %s535_s10 = scalar_lea.hbm %s771_s2, 16 }
  0x36   :  { %p536_p10 = scmp.ne.s32.totalorder %s771_s2, %s535_s10  ;;  %p539_p11 = scmp.lt.u32.totalorder %s535_s10, %s771_s2 }
  0x38   :  { %p541_p12 = pnand %p539_p11, %p536_p10 }
  0x3a   :  { %544 = shalt.err (!%p541_p12)
}
  0x3b   :  { %s545_s15 = scalar_lea.vmem %s45_s22, 16  ;;  %s549_s16 = scalar_lea.vmem %s45_s22, 32 }
  0x3c   :  { %p546_p13 = scmp.ne.s32.totalorder %s45_s22, %s545_s15  ;;  %p550_p0 = scmp.lt.s32.totalorder %s45_s22, %s45_s22 }
  0x3d   :  { %p551_p1 = scmp.lt.s32.totalorder %s549_s16, %s545_s15 }
  0x3f   :  { %p552_p2 = por %p551_p1, %p550_p0 }
  0x41   :  { %p553_p3 = pnand %p552_p2, %p546_p13 }
  0x43   :  { %556 = shalt.err (!%p553_p3)
}
  0x44   :  { %47 = dma.hbm_to_vmem [thread:$0]  %s771_s2, 16, %s45_s22, [#allocation7]  }
  0x45   :  { %s615_s17 = smov [#allocation11]   ;;  %s557_s23 = scalar_lea.hbm %s773_s4, 16 }
  0x46   :  { %s66_s18 = sshll.u32 %s615_s17, 4  ;;  %p558_p4 = scmp.ne.s32.totalorder %s773_s4, %s557_s23  ;;  %s67_s18 = int_to_ptr.vmem [resolvable:$true] %s66_s18 }
  0x47   :  { %p561_p5 = scmp.lt.u32.totalorder %s557_s23, %s773_s4 }
  0x49   :  { %p563_p6 = pnand %p561_p5, %p558_p4 }
  0x4b   :  { %566 = shalt.err (!%p563_p6)
}
  0x4c   :  { %s567_s28 = scalar_lea.vmem %s67_s18, 16  ;;  %s571_s2 = scalar_lea.vmem %s67_s18, 32 }
  0x4d   :  { %p568_p7 = scmp.ne.s32.totalorder %s67_s18, %s567_s28  ;;  %p572_p8 = scmp.lt.s32.totalorder %s67_s18, %s67_s18 }
  0x4e   :  { %p573_p9 = scmp.lt.s32.totalorder %s571_s2, %s567_s28 }
  0x50   :  { %p574_p10 = por %p573_p9, %p572_p8 }
  0x52   :  { %p575_p11 = pnand %p574_p10, %p568_p7 }
  0x54   :  { %578 = shalt.err (!%p575_p11)
}
  0x55   :  { %69 = dma.hbm_to_vmem [thread:$0]  %s773_s4, 16, %s67_s18, [#allocation10]  }
  0x56   :  { %601 = dma.done.wait [#allocation4], 256  }
  0x57   :  { %602 = vsyncadd [#allocation4], 4294967040 }
  0x58   :  { %603 = dma.done.wait [#allocation7], 1040  }
  0x59   :  { %604 = vsyncadd [#allocation7], 4294966256 }
  0x5a   :  { %605 = dma.done.wait [#allocation10], 1040  }
  0x5b   :  { %606 = vsyncadd [#allocation10], 4294966256  ;;  %vm89_vm0 = vcmask 261120   ;;  %v94_v1 = vld [vmem:[#allocation6] sm:$0xff]  ;;  %v95_v2 = vld [vmem:[#allocation6 + $0x8] sm:$0xff]  ;;  %v616_v27 = vmov 0.0  }
  0x5c   :  { %vm726_vm1 = vmpackc.low %vm89_vm0, %vm89_vm0  ;;  %v96_v3 = vld [vmem:[#allocation6 + $0x10] sm:$0xff]  ;;  %v420_v4 = vpack.c.bf16 %v95_v2, %v94_v1  ;;  %v97_v5 = vld [vmem:[#allocation6 + $0x18] sm:$0xff]  ;;  %91 = vst.msk [vmem:[#allocation2 + $0x8] sm:$0xff] %vm89_vm0, %v616_v27  ;;  %vm227_vm2 = vcmask 523264   ;;  %s617_s4 = smov [#allocation12]  }
  0x5d   :  { %v426_v6 = vpack.c.bf16 %v97_v5, %v96_v3  ;;  %v92_v7 = vld [vmem:[#allocation3] sm:$0xff]  ;;  %v219_v8 = vld [vmem:[#allocation9] sm:$0xff]  ;;  %v222_v12 = vld [vmem:[#allocation9 + $0x18] sm:$0xff]  ;;  %90 = vst.msk [vmem:[#allocation2] sm:$0xff] %vm89_vm0, %v616_v27  ;;  %s334_s3 = sshll.u32 %s617_s4, 4  ;;  %s335_s3 = int_to_ptr.vmem [resolvable:$true] %s334_s3 }
  0x5e   :  { %422 = vmatprep.subr.msk.bf16.mxu0 %vm726_vm1, %v420_v4  ;;  %398 = vmatprep.mubr.msk.f32.mxu0 %vm89_vm0, %v92_v7  ;;  %v220_v9 = vld [vmem:[#allocation9 + $0x8] sm:$0xff]  ;;  %v221_v11 = vld [vmem:[#allocation9 + $0x10] sm:$0xff]  ;;  %v223_v14 = vld [vmem:[#allocation9 + $0x20] sm:$0xff]  ;;  %s579_s21 = scalar_lea.vmem %s335_s3, 256  ;;  %p584_p13 = scmp.lt.s32.totalorder %s335_s3, %s335_s3 }
  0x5f   :  { %425 = vmatpush3.bf16.xpose.msk.msra.mxu0 %vm726_vm1, %v420_v4  ;;  %v444_v10 = vpack.c.bf16 %v220_v9, %v219_v8  ;;  %v448_v13 = vpack.c.bf16 %v222_v12, %v221_v11  ;;  %v224_v15 = vld [vmem:[#allocation9 + $0x28] sm:$0xff]  ;;  %v98_v16 = vld [vmem:[#allocation6 + $0x20] sm:$0xff]  ;;  %v101_v21 = vld [vmem:[#allocation6 + $0x38] sm:$0xff]  ;;  %p580_p12 = scmp.ne.s32.totalorder %s335_s3, %s579_s21  ;;  %p585_p0 = scmp.lt.s32.totalorder %s579_s21, %s579_s21 }
  0x60   :  { %428 = vmatprep.subr.msk.bf16.mxu0 %vm726_vm1, %v426_v6  ;;  %v99_v17 = vld [vmem:[#allocation6 + $0x28] sm:$0xff]  ;;  %v452_v18 = vpack.c.bf16 %v224_v15, %v223_v14  ;;  %v100_v20 = vld [vmem:[#allocation6 + $0x30] sm:$0xff]  ;;  %v93_v23 = vld [vmem:[#allocation3 + $0x8] sm:$0xff] }
  0x61   :  { %445 = vmatprep.subr.bf16.mxu1 %v444_v10  ;;  %v432_v19 = vpack.c.bf16 %v99_v17, %v98_v16  ;;  %v438_v22 = vpack.c.bf16 %v101_v21, %v100_v20  ;;  %v225_v24 = vld [vmem:[#allocation9 + $0x30] sm:$0xff]  ;;  %v226_v25 = vld [vmem:[#allocation9 + $0x38] sm:$0xff]  ;;  %v361_v41 = vld [vmem:[#allocation11] ss:$0 sm:$0xff]  ;;  %p586_p1 = por %p585_p0, %p584_p13 }
  0x62   :  { %447 = vmatpush3.bf16.msra.mxu1 %v444_v10  ;;  %v456_v26 = vpack.c.bf16 %v226_v25, %v225_v24  ;;  %v348_v28 = vld [vmem:[#allocation8] ss:$0 sm:$0xff] }
  0x63   :  { %449 = vmatprep.subr.bf16.mxu1 %v448_v13  ;;  %v218_v35 = vld [vmem:[#allocation2 + $0x8] sm:$0xff]  ;;  %p587_p2 = pnand %p586_p1, %p580_p12 }
  0x64   :  { %v217_v36 = vld [vmem:[#allocation2] sm:$0xff] }
  0x66   :  { %451 = vmatpush3.bf16.msra.mxu1 %v448_v13 }
  0x67   :  { %431 = vmatpush3.bf16.xpose.msk.msra.mxu0 %vm726_vm1, %v426_v6  ;;  %453 = vmatprep.subr.bf16.mxu1 %v452_v18 }
  0x68   :  { %434 = vmatprep.subr.msk.bf16.mxu0 %vm726_vm1, %v432_v19 }
  0x6a   :  { %455 = vmatpush3.bf16.msra.mxu1 %v452_v18 }
  0x6b   :  { %457 = vmatprep.subr.bf16.mxu1 %v456_v26 }
  0x6e   :  { %459 = vmatpush3.bf16.msra.mxu1 %v456_v26 }
  0x6f   :  { %437 = vmatpush3.bf16.xpose.msk.msra.mxu0 %vm726_vm1, %v432_v19 }
  0x70   :  { %440 = vmatprep.subr.msk.bf16.mxu0 %vm726_vm1, %v438_v22 }
  0x77   :  { %443 = vmatpush3.bf16.xpose.msk.msra.mxu0 %vm726_vm1, %v438_v22 }
  0x7e   :  { %399 = vmatmul.mubr.msk.f32.vlgmr.msra.gmra.mrb[0].mxu0 %vm89_vm0, %v93_v23 }
 0x151   :  { %v400_v29 = vpop.f32.mrb[0].mxu0 }
 0x152   :  { %v212_v30 = vadd.f32 %v400_v29, %v348_v28  ;;  %v206_v31 = vpop.f32.mrb[1].mxu0 }
 0x153   :  { %v207_v32 = vadd.f32 %v348_v28, %v206_v31 }
 0x154   :  { %v216_v34 = vmax.f32 %v212_v30, 0.0 }
 0x155   :  { %v215_v33 = vmax.f32 %v207_v32, 0.0 }
 0x157   :  { %417 = vmatprep.mubr.msk.f32.mxu1 %vm227_vm2, %v215_v33 }
 0x158   :  { %418 = vmatmul.mubr.msk.f32.vlgmr.msra.gmra.mrb[0].mxu1 %vm227_vm2, %v216_v34 }
 0x22b   :  { %v419_v37 = vpop.f32.mrb[0].mxu1 }
 0x22c   :  { %v310_v38 = vadd.f32 %v419_v37, %v218_v35  ;;  %v300_v39 = vpop.f32.mrb[1].mxu1 }
 0x22d   :  { %v309_v40 = vadd.f32 %v300_v39, %v217_v36 }
 0x22e   :  { %312 = vst.msk [vmem:[#allocation2 + $0x8] sm:$0xff] %vm89_vm0, %v310_v38 }
 0x22f   :  { %311 = vst.msk [vmem:[#allocation2] sm:$0xff] %vm89_vm0, %v309_v40 }
 0x235   :  { %v317_v42 = vld [vmem:[#allocation2 + $0x8] sm:$0xff] }
 0x236   :  { %v316_v43 = vld [vmem:[#allocation2] sm:$0xff]  ;;  %v326_v44 = vadd.f32 %v361_v41, %v317_v42 }
 0x237   :  { %v325_v45 = vadd.f32 %v361_v41, %v316_v43 }
 0x238   :  { %328 = vst.msk [vmem:[#allocation12 + $0x8] sm:$0xff] %vm89_vm0, %v326_v44 }
 0x239   :  { %327 = vst.msk [vmem:[#allocation12] sm:$0xff] %vm89_vm0, %v325_v45 }
 0x23a   :  { %590 = shalt.err (!%p587_p2)
}
 0x23b   :  { %s591_s9 = scalar_lea.hbm %s774_s5, 256 }
 0x23c   :  { %p592_p3 = scmp.ne.s32.totalorder %s774_s5, %s591_s9  ;;  %p595_p4 = scmp.lt.u32.totalorder %s591_s9, %s774_s5 }
 0x23e   :  { %p597_p5 = pnand %p595_p4, %p592_p3 }
 0x240   :  { %600 = shalt.err (!%p597_p5)
}
 0x241   :  { %340 = dma.vmem_to_hbm [thread:$0]  %s335_s3, 256, %s774_s5, [#allocation5], %s611_s30, %s611_s30, %s612_s6  }
 0x242   :  { %607 = dma.done.wait [#allocation5], 256  }
 0x243   :  { %608 = vsyncadd [#allocation5], 4294967040 }
 0x244   :  { %344 = vsyncpa [#allocation4], 1 }
 0x245   :  { %345 = vsyncpa [#allocation7], 1 }
 0x246   :  { %346 = vsyncpa [#allocation10], 1 }
 0x247   :  { %347 = vsyncpa [#allocation5], 1 }

</bundles_post_ra>
